<compile_context>
chip_gen: v7x
topology: tpu7x:2x2x1
jax: 0.10.0
libtpu: 0.0.40
codegen_flags: <defaults>
</compile_context>

<pallas_src>
import jax
import jax.numpy as jnp
from jax.experimental import pallas as pl
from jax.experimental.pallas import tpu as pltpu


def _matmul_kernel(lhs_ref, w_ref, o_ref):
    """One (TM, K) x (K, Cout) MXU matmul per grid step, f32 accumulation, bf16 store."""
    o_ref[...] = jnp.dot(lhs_ref[...], w_ref[...],
                         preferred_element_type=jnp.float32).astype(o_ref.dtype)


def simplenet_forward(x_nchw, weight_oihw):
    """Conv2d(64,128,(3,3),stride=(2,2),padding=(1,1),bias=False) then flatten(start_dim=1)."""
    N, Cin, H, W = x_nchw.shape
    Cout, Cin_w, KH, KW = weight_oihw.shape
    assert Cin == Cin_w
    SH = SW = 2
    PH = PW = 1
    Ho = (H + 2 * PH - KH) // SH + 1
    Wo = (W + 2 * PW - KW) // SW + 1
    M = N * Ho * Wo
    K = KH * KW * Cin

    # ---- Wrapper-side im2col (XLA-fused layout glue, ~M*K*2 bytes ~ 147 KB at toy size) ----
    # NCHW -> NHWC, zero-pad, gather the nine stride-2 conv taps as strided slices, and
    # concatenate along K in (kh, kw, cin) order.  This is the lane-dense LHS the kernel eats.
    x_nhwc = jnp.transpose(x_nchw, (0, 2, 3, 1))
    x_pad = jnp.pad(x_nhwc, ((0, 0), (PH, PH), (PW, PW), (0, 0)))
    taps = []
    for kh in range(KH):
        for kw in range(KW):
            patch = x_pad[:, kh:kh + SH * Ho:SH, kw:kw + SW * Wo:SW, :]   # (N, Ho, Wo, Cin)
            taps.append(patch.reshape(M, Cin))
    lhs = jnp.concatenate(taps, axis=-1)                                  # (M, K) = (128, 576)

    # Weights: OIHW -> (KH, KW, Cin, Cout) -> (K, Cout); row order matches the tap order above.
    w2d = jnp.transpose(weight_oihw, (2, 3, 1, 0)).reshape(K, Cout)

    # ---- Tiling over M (single step at this toy size; "parallel" for megacore at scale) ----
    if M % 256 == 0:
        TM = 256          # v6e/v7x sweet spot (see scaling note above)
    else:
        TM = M            # toy size: one lane-dense (128, 576) x (576, 128) matmul
    assert M % TM == 0
    grid = (M // TM,)

    out_bytes = M * Cout * jnp.dtype(x_nchw.dtype).itemsize
    cost = pl.CostEstimate(
        flops=2 * M * K * Cout,
        transcendentals=0,
        bytes_accessed=lhs.size * lhs.dtype.itemsize
        + w2d.size * w2d.dtype.itemsize
        + out_bytes,
    )

    out2d = pl.pallas_call(
        _matmul_kernel,
        out_shape=jax.ShapeDtypeStruct((M, Cout), x_nchw.dtype),
        grid=grid,
        in_specs=[
            pl.BlockSpec((TM, K), lambda i: (i, 0)),        # LHS tile streams over M
            pl.BlockSpec((K, Cout), lambda i: (0, 0)),      # weights resident across steps
        ],
        out_specs=pl.BlockSpec((TM, Cout), lambda i: (i, 0)),
        compiler_params=pltpu.CompilerParams(
            dimension_semantics=("parallel",)),
        cost_estimate=cost,
    )(lhs, w2d)

    # PyTorch semantics: conv output is (N, Cout, Ho, Wo); flatten(start_dim=1) is channel-major.
    y = out2d.reshape(N, Ho, Wo, Cout).transpose(0, 3, 1, 2).reshape(N, Cout * Ho * Wo)
    return y


if __name__ == "__main__":
    key = jax.random.PRNGKey(0)
    kx, kw = jax.random.split(key)

    N, Cin, H, W = 2, 64, 16, 16
    Cout, KH, KW = 128, 3, 3

    # Deterministic synthetic params/input (bf16, matching the test's channels_last bf16 usage).
    x = jax.random.uniform(kx, (N, Cin, H, W), dtype=jnp.float32).astype(jnp.bfloat16)
    bound = 1.0 / (Cin * KH * KW) ** 0.5   # PyTorch kaiming-uniform-style bound
    weight = jax.random.uniform(kw, (Cout, Cin, KH, KW), minval=-bound, maxval=bound,
                                dtype=jnp.float32).astype(jnp.bfloat16)

    y = jax.jit(simplenet_forward)(x, weight)
    y = jax.block_until_ready(y)

    # Reference check (same bf16 values, f32 math).
    ref = jax.lax.conv_general_dilated(
        x.astype(jnp.float32), weight.astype(jnp.float32),
        window_strides=(2, 2), padding=((1, 1), (1, 1)),
        dimension_numbers=("NCHW", "OIHW", "NCHW")).reshape(N, -1)
    assert y.shape == (N, Cout * (H // 2) * (W // 2))
    err = float(jnp.max(jnp.abs(y.astype(jnp.float32) - ref)))
    assert err < 0.05, f"max abs err {err}"

    print("KERNEL_OK")
</pallas_src>

<mosaic_0001>
module attributes {stable_mosaic.version = 11 : i64} {
  func.func @_matmul_kernel(%arg0: i32, %arg1: memref<128x576xbf16, #tpu.memory_space<vmem>>, %arg2: memref<576x128xbf16, #tpu.memory_space<vmem>>, %arg3: memref<128x128xbf16, #tpu.memory_space<vmem>>) attributes {dimension_semantics = [#tpu.dimension_semantics<parallel>], iteration_bounds = array<i64: 1>, scalar_prefetch = 0 : i64, scratch_operands = 0 : i64, tpu.core_type = #tpu.core_type<tc>, window_params = [{transform_indices = @transform_0, window_bounds = array<i64: 128, 576>}, {pipeline_mode = #tpu.pipeline_mode<synchronous>, transform_indices = @transform_1, window_bounds = array<i64: 576, 128>}, {transform_indices = @transform_2, window_bounds = array<i64: 128, 128>}]} {
    %c0 = arith.constant 0 : index
    %c0_0 = arith.constant 0 : index
    %0 = vector.load %arg1[%c0, %c0_0] : memref<128x576xbf16, #tpu.memory_space<vmem>>, vector<128x576xbf16>
    %c0_1 = arith.constant 0 : index
    %c0_2 = arith.constant 0 : index
    %1 = vector.load %arg2[%c0_1, %c0_2] : memref<576x128xbf16, #tpu.memory_space<vmem>>, vector<576x128xbf16>
    %cst = arith.constant dense<0.000000e+00> : vector<128x128xf32>
    %2 = tpu.matmul %0, %1, %cst {dimension_numbers = #tpu.dot_dimension_numbers<[1], [0], [0], [1], [0, 0, 1, 1], [], []>} : vector<128x576xbf16>, vector<576x128xbf16>, vector<128x128xf32> -> vector<128x128xf32>
    %3 = arith.truncf %2 : vector<128x128xf32> to vector<128x128xbf16>
    %c0_3 = arith.constant 0 : index
    %c0_4 = arith.constant 0 : index
    %4 = vector.load %arg3[%c0_3, %c0_4] : memref<128x128xbf16, #tpu.memory_space<vmem>>, vector<128x128xbf16>
    tpu.vector_store %arg3[%c0_3, %c0_4], %3 {strides = array<i32>} : memref<128x128xbf16, #tpu.memory_space<vmem>>, vector<128x128xbf16>,
    return
  }
  func.func @transform_0(%arg0: i32) -> (i32, i32) {
    %c0_i32 = arith.constant 0 : i32
    %c0_i32_0 = arith.constant 0 : i32
    return %arg0, %c0_i32 : i32, i32
  }
  func.func @transform_1(%arg0: i32) -> (i32, i32) {
    %c0_i32 = arith.constant 0 : i32
    %c0_i32_0 = arith.constant 0 : i32
    %c0_i32_1 = arith.constant 0 : i32
    return %c0_i32, %c0_i32_0 : i32, i32
  }
  func.func @transform_2(%arg0: i32) -> (i32, i32) {
    %c0_i32 = arith.constant 0 : i32
    %c0_i32_0 = arith.constant 0 : i32
    return %arg0, %c0_i32 : i32, i32
  }
}

</mosaic_0001>

<bundles_post_ra>
// kernel: simplenet_forward.1
= control target key start
LH: loop header
LB: loop body
LE: loop exit
PB: predicated region body
PF: predicated region fallthrough
CT: control target
= control target key end

     0   :  { %vm548_vm0 = vcmask 523264   ;;  %s1674_s1 = inlined_call_operand.vmem [shape: bf16[576,128], index: 1, kind: input, shape index: {}]   ;;  %s1675_s0 = inlined_call_operand.vmem [shape: bf16[128,576], index: 0, kind: input, shape index: {}]   ;;  %s1676_s2 = inlined_call_operand.vmem [shape: bf16[128,128], index: 2, kind: output, shape index: {}]  }
   0x1   :  { %v1283_v0 = vld [vmem:[%s1674_s1 + $0x40] sm:$0xff]   ;;  %v1287_v4 = vld [vmem:[%s1674_s1 + $0x48] sm:$0xff]   ;;  %v1291_v8 = vld [vmem:[%s1674_s1 + $0x50] sm:$0xff]  }
   0x2   :  { %v1284_v1 = vld [vmem:[%s1674_s1 + $0xc0] sm:$0xff]   ;;  %1111 = vmatprep.subr.bf16.mxu0 %v1283_v0  ;;  %v1288_v5 = vld [vmem:[%s1674_s1 + $0xc8] sm:$0xff]   ;;  %v1292_v9 = vld [vmem:[%s1674_s1 + $0xd0] sm:$0xff]  }
   0x3   :  { %v1285_v2 = vld [vmem:[%s1674_s1] sm:$0xff]   ;;  %1175 = vmatprep.subr.bf16.mxu1 %v1284_v1  ;;  %v1289_v6 = vld [vmem:[%s1674_s1 + $0x8] sm:$0xff]   ;;  %v1293_v10 = vld [vmem:[%s1674_s1 + $0x10] sm:$0xff]  }
   0x4   :  { %v1286_v3 = vld [vmem:[%s1674_s1 + $0x80] sm:$0xff]   ;;  %1112 = vmatpush3.bf16.msra.mxu0 %v1285_v2  ;;  %v1290_v7 = vld [vmem:[%s1674_s1 + $0x88] sm:$0xff]   ;;  %v1294_v11 = vld [vmem:[%s1674_s1 + $0x90] sm:$0xff]  }
   0x5   :  { %1176 = vmatpush3.bf16.msra.mxu1 %v1286_v3  ;;  %1113 = vmatprep.subr.bf16.mxu0 %v1287_v4  ;;  %v1295_v12 = vld [vmem:[%s1674_s1 + $0x58] sm:$0xff]   ;;  %v1299_v16 = vld [vmem:[%s1674_s1 + $0x60] sm:$0xff]   ;;  %v1303_v20 = vld [vmem:[%s1674_s1 + $0x68] sm:$0xff]  }
   0x6   :  { %1177 = vmatprep.subr.bf16.mxu1 %v1288_v5  ;;  %v1296_v13 = vld [vmem:[%s1674_s1 + $0xd8] sm:$0xff]   ;;  %v1300_v17 = vld [vmem:[%s1674_s1 + $0xe0] sm:$0xff]   ;;  %v1304_v21 = vld [vmem:[%s1674_s1 + $0xe8] sm:$0xff]  }
   0x7   :  { %v1297_v14 = vld [vmem:[%s1674_s1 + $0x18] sm:$0xff]   ;;  %v1301_v18 = vld [vmem:[%s1674_s1 + $0x20] sm:$0xff]   ;;  %v1305_v22 = vld [vmem:[%s1674_s1 + $0x28] sm:$0xff]  }
   0x8   :  { %1114 = vmatpush3.bf16.msra.mxu0 %v1289_v6  ;;  %v1298_v15 = vld [vmem:[%s1674_s1 + $0x98] sm:$0xff]   ;;  %v1302_v19 = vld [vmem:[%s1674_s1 + $0xa0] sm:$0xff]   ;;  %v1306_v23 = vld [vmem:[%s1674_s1 + $0xa8] sm:$0xff]  }
   0x9   :  { %1178 = vmatpush3.bf16.msra.mxu1 %v1290_v7  ;;  %1115 = vmatprep.subr.bf16.mxu0 %v1291_v8  ;;  %v1307_v24 = vld [vmem:[%s1674_s1 + $0x70] sm:$0xff]   ;;  %v1311_v28 = vld [vmem:[%s1674_s1 + $0x78] sm:$0xff]   ;;  %v1320_v35 = vld [vmem:[%s1675_s0 + $0xc] ss:$20 sps:$4 sm:$0xff]  }
   0xa   :  { %1179 = vmatprep.subr.bf16.mxu1 %v1292_v9  ;;  %v1308_v25 = vld [vmem:[%s1674_s1 + $0xf0] sm:$0xff]   ;;  %v1312_v29 = vld [vmem:[%s1674_s1 + $0xf8] sm:$0xff]   ;;  %v1321_v36 = vld [vmem:[%s1674_s1 + $0x100] sm:$0xff]   ;;  %702 = vmatprep.mubr.bf16.mxu1 %v1320_v35 }
   0xb   :  { %v1309_v26 = vld [vmem:[%s1674_s1 + $0x30] sm:$0xff]   ;;  %v1313_v30 = vld [vmem:[%s1674_s1 + $0x38] sm:$0xff]   ;;  %v1322_v37 = vld [vmem:[%s1675_s0 + $0x2c] ss:$20 sps:$4 sm:$0xff]  }
   0xc   :  { %1116 = vmatpush3.bf16.msra.mxu0 %v1293_v10  ;;  %v1310_v27 = vld [vmem:[%s1674_s1 + $0xb0] sm:$0xff]   ;;  %v1314_v31 = vld [vmem:[%s1674_s1 + $0xb8] sm:$0xff]   ;;  %v1334_v42 = vld [vmem:[%s1674_s1 + $0x108] sm:$0xff]  }
   0xd   :  { %1180 = vmatpush3.bf16.msra.mxu1 %v1294_v11  ;;  %1117 = vmatprep.subr.bf16.mxu0 %v1295_v12  ;;  %v1315_v32 = vld [vmem:[%s1675_s0] ss:$20 sps:$4 sm:$0xff]   ;;  %v1317_v33 = vld [vmem:[%s1675_s0 + $0x4] ss:$20 sps:$4 sm:$0xff]   ;;  %v1318_v34 = vld [vmem:[%s1675_s0 + $0x8] ss:$20 sps:$4 sm:$0xff]  }
   0xe   :  { %1181 = vmatprep.subr.bf16.mxu1 %v1296_v13  ;;  %605 = vmatprep.mubr.bf16.mxu0 %v1317_v33  ;;  %v1324_v38 = vld [vmem:[%s1675_s0 + $0x34] ss:$20 sps:$4 sm:$0xff]   ;;  %v1327_v40 = vld [vmem:[%s1675_s0 + $0x30] ss:$20 sps:$4 sm:$0xff]   ;;  %v1333_v45 = vld [vmem:[%s1675_s0 + $0x58] ss:$20 sps:$4 sm:$0xff]  }
   0xf   :  { %v1326_v39 = vld [vmem:[%s1675_s0 + $0x28] ss:$20 sps:$4 sm:$0xff]   ;;  %v1332_v44 = vld [vmem:[%s1675_s0 + $0x50] ss:$20 sps:$4 sm:$0xff]   ;;  %v1339_v50 = vld [vmem:[%s1675_s0 + $0x78] ss:$20 sps:$4 sm:$0xff]  }
  0x10   :  { %1118 = vmatpush3.bf16.msra.mxu0 %v1297_v14  ;;  %v1328_v41 = vld [vmem:[%s1675_s0 + $0x54] ss:$20 sps:$4 sm:$0xff]   ;;  %v1330_v43 = vld [vmem:[%s1675_s0 + $0x5c] ss:$20 sps:$4 sm:$0xff]   ;;  %v1337_v48 = vld [vmem:[%s1675_s0 + $0x84] ss:$20 sps:$4 sm:$0xff]  }
  0x11   :  { %1182 = vmatpush3.bf16.msra.mxu1 %v1298_v15  ;;  %1119 = vmatprep.subr.bf16.mxu0 %v1299_v16  ;;  %v1347_v46 = vld [vmem:[%s1674_s1 + $0x110] sm:$0xff]   ;;  %v1360_v49 = vld [vmem:[%s1674_s1 + $0x118] sm:$0xff]   ;;  %v1343_v53 = vld [vmem:[%s1675_s0 + $0xac] ss:$20 sps:$4 sm:$0xff]  }
  0x12   :  { %1183 = vmatprep.subr.bf16.mxu1 %v1300_v17  ;;  %v1335_v47 = vld [vmem:[%s1675_s0 + $0x7c] ss:$20 sps:$4 sm:$0xff]   ;;  %v1340_v51 = vld [vmem:[%s1675_s0 + $0x80] ss:$20 sps:$4 sm:$0xff]   ;;  %v1341_v52 = vld [vmem:[%s1675_s0 + $0xa4] ss:$20 sps:$4 sm:$0xff]  }
  0x13   :  { %v1345_v54 = vld [vmem:[%s1675_s0 + $0xa0] ss:$20 sps:$4 sm:$0xff]   ;;  %v1346_v55 = vld [vmem:[%s1675_s0 + $0xa8] ss:$20 sps:$4 sm:$0xff]   ;;  %v1353_v59 = vld [vmem:[%s1675_s0 + $0xd0] ss:$20 sps:$4 sm:$0xff]  }
  0x14   :  { %1120 = vmatpush3.bf16.msra.mxu0 %v1301_v18  ;;  %v1348_v56 = vld [vmem:[%s1675_s0 + $0xcc] ss:$20 sps:$4 sm:$0xff]   ;;  %v1350_v57 = vld [vmem:[%s1675_s0 + $0xd4] ss:$20 sps:$4 sm:$0xff]   ;;  %v1356_v61 = vld [vmem:[%s1675_s0 + $0xfc] ss:$20 sps:$4 sm:$0xff]  }
  0x15   :  { %1184 = vmatpush3.bf16.msra.mxu1 %v1302_v19  ;;  %1121 = vmatprep.subr.bf16.mxu0 %v1303_v20  ;;  %v1352_v58 = vld [vmem:[%s1675_s0 + $0xc8] ss:$20 sps:$4 sm:$0xff]   ;;  %v1358_v62 = vld [vmem:[%s1675_s0 + $0xf0] ss:$20 sps:$4 sm:$0xff]   ;;  %v1359_v63 = vld [vmem:[%s1675_s0 + $0xf8] ss:$20 sps:$4 sm:$0xff]  }
  0x16   :  { %1185 = vmatprep.subr.bf16.mxu1 %v1304_v21  ;;  %v1354_v60 = vld [vmem:[%s1675_s0 + $0xf4] ss:$20 sps:$4 sm:$0xff]   ;;  %v1361_v0 = vld [vmem:[%s1675_s0 + $0x11c] ss:$20 sps:$4 sm:$0xff]   ;;  %v1363_v1 = vld [vmem:[%s1675_s0 + $0x124] ss:$20 sps:$4 sm:$0xff]  }
  0x17   :  { %v1365_v2 = vld [vmem:[%s1675_s0 + $0x118] ss:$20 sps:$4 sm:$0xff]   ;;  %v1366_v3 = vld [vmem:[%s1675_s0 + $0x120] ss:$20 sps:$4 sm:$0xff]   ;;  %v1367_v4 = vld [vmem:[%s1675_s0 + $0x10] ss:$20 sps:$4 sm:$0xff]  }
  0x18   :  { %1122 = vmatpush3.bf16.msra.mxu0 %v1305_v22  ;;  %v1368_v5 = vld [vmem:[%s1675_s0 + $0xb0] ss:$20 sps:$4 sm:$0xff]   ;;  %v1369_v6 = vld [vmem:[%s1675_s0 + $0x38] ss:$20 sps:$4 sm:$0xff]   ;;  %v1371_v8 = vld [vmem:[%s1675_s0 + $0x60] ss:$20 sps:$4 sm:$0xff]  }
  0x19   :  { %1186 = vmatpush3.bf16.msra.mxu1 %v1306_v23  ;;  %1123 = vmatprep.subr.bf16.mxu0 %v1307_v24  ;;  %v1370_v7 = vld [vmem:[%s1675_s0 + $0xd8] ss:$20 sps:$4 sm:$0xff]   ;;  %v1372_v9 = vld [vmem:[%s1675_s0 + $0x100] ss:$20 sps:$4 sm:$0xff]   ;;  %v1373_v10 = vld [vmem:[%s1675_s0 + $0x88] ss:$20 sps:$4 sm:$0xff]  }
  0x1a   :  { %1187 = vmatprep.subr.bf16.mxu1 %v1308_v25  ;;  %v1374_v11 = vld [vmem:[%s1675_s0 + $0x128] ss:$20 sps:$4 sm:$0xff]  }
  0x1c   :  { %1124 = vmatpush3.bf16.msra.mxu0 %v1309_v26 }
  0x1d   :  { %1188 = vmatpush3.bf16.msra.mxu1 %v1310_v27  ;;  %1125 = vmatprep.subr.bf16.mxu0 %v1311_v28 }
  0x1e   :  { %1189 = vmatprep.subr.bf16.mxu1 %v1312_v29 }
  0x20   :  { %1126 = vmatpush3.bf16.msra.mxu0 %v1313_v30 }
  0x21   :  { %1190 = vmatpush3.bf16.msra.mxu1 %v1314_v31  ;;  %1251 = vmatprep.subr.bf16.mxu0 %v1321_v36 }
  0x22   :  { %1275 = vmatprep.subr.bf16.mxu1 %v1321_v36 }
  0x23   :  { %606 = vmatmul.mubr.bf16.vlgmr.msra.gmra.mrb[0].mxu0 %v1315_v32 }
  0x24   :  { %703 = vmatmul.mubr.bf16.vlgmr.msra.gmra.mrb[0].mxu1 %v1318_v34  ;;  %1252 = vmatpush3.bf16.msra.mxu0 %v1321_v36 }
  0x25   :  { %1279 = vmatpush3.bf16.msra.mxu1 %v1321_v36  ;;  %613 = vmatprep.mubr.bf16.mxu0 %v1322_v37 }
  0x26   :  { %710 = vmatprep.mubr.bf16.mxu1 %v1324_v38  ;;  %1253 = vmatprep.subr.bf16.mxu0 %v1334_v42 }
  0x27   :  { %1276 = vmatprep.subr.bf16.mxu1 %v1334_v42 }
  0x28   :  { %1254 = vmatpush3.bf16.msra.mxu0 %v1334_v42 }
  0x29   :  { %1280 = vmatpush3.bf16.msra.mxu1 %v1334_v42  ;;  %1255 = vmatprep.subr.bf16.mxu0 %v1347_v46 }
  0x2a   :  { %1277 = vmatprep.subr.bf16.mxu1 %v1347_v46 }
  0x2b   :  { %614 = vmatmul.mubr.bf16.gmra.mrb[4].mxu0 %v1326_v39 }
  0x2c   :  { %711 = vmatmul.mubr.bf16.gmra.mrb[4].mxu1 %v1327_v40  ;;  %621 = vmatprep.mubr.bf16.mxu0 %v1328_v41 }
  0x2d   :  { %718 = vmatprep.mubr.bf16.mxu1 %v1330_v43  ;;  %1256 = vmatpush3.bf16.msra.mxu0 %v1347_v46 }
  0x2e   :  { %1281 = vmatpush3.bf16.msra.mxu1 %v1347_v46  ;;  %1257 = vmatprep.subr.bf16.mxu0 %v1360_v49 }
  0x2f   :  { %1278 = vmatprep.subr.bf16.mxu1 %v1360_v49 }
  0x31   :  { %1258 = vmatpush3.bf16.msra.mxu0 %v1360_v49 }
  0x32   :  { %1282 = vmatpush3.bf16.msra.mxu1 %v1360_v49 }
  0x33   :  { %622 = vmatmul.mubr.bf16.gmra.mrb[8].mxu0 %v1332_v44 }
  0x34   :  { %719 = vmatmul.mubr.bf16.gmra.mrb[8].mxu1 %v1333_v45  ;;  %629 = vmatprep.mubr.bf16.mxu0 %v1335_v47 }
  0x35   :  { %726 = vmatprep.mubr.bf16.mxu1 %v1337_v48 }
  0x3b   :  { %630 = vmatmul.mubr.bf16.gmra.mrb[12].mxu0 %v1339_v50 }
  0x3c   :  { %727 = vmatmul.mubr.bf16.gmra.mrb[12].mxu1 %v1340_v51  ;;  %637 = vmatprep.mubr.bf16.mxu0 %v1341_v52 }
  0x3d   :  { %734 = vmatprep.mubr.bf16.mxu1 %v1343_v53 }
  0x43   :  { %638 = vmatmul.mubr.bf16.gmra.mrb[16].mxu0 %v1345_v54 }
  0x44   :  { %735 = vmatmul.mubr.bf16.gmra.mrb[16].mxu1 %v1346_v55  ;;  %645 = vmatprep.mubr.bf16.mxu0 %v1348_v56 }
  0x45   :  { %742 = vmatprep.mubr.bf16.mxu1 %v1350_v57 }
  0x4b   :  { %646 = vmatmul.mubr.bf16.gmra.mrb[20].mxu0 %v1352_v58 }
  0x4c   :  { %743 = vmatmul.mubr.bf16.gmra.mrb[20].mxu1 %v1353_v59  ;;  %653 = vmatprep.mubr.bf16.mxu0 %v1354_v60 }
  0x4d   :  { %750 = vmatprep.mubr.bf16.mxu1 %v1356_v61 }
  0x53   :  { %654 = vmatmul.mubr.bf16.gmra.mrb[24].mxu0 %v1358_v62 }
  0x54   :  { %751 = vmatmul.mubr.bf16.gmra.mrb[24].mxu1 %v1359_v63  ;;  %661 = vmatprep.mubr.bf16.mxu0 %v1361_v0 }
  0x55   :  { %758 = vmatprep.mubr.bf16.mxu1 %v1363_v1 }
  0x5b   :  { %662 = vmatmul.mubr.bf16.gmra.mrb[28].mxu0 %v1365_v2 }
  0x5c   :  { %759 = vmatmul.mubr.bf16.gmra.mrb[28].mxu1 %v1366_v3  ;;  %1259 = vmatprep.mubr.msk.bf16.mxu0 %vm548_vm0, %v1367_v4 }
  0x5d   :  { %1267 = vmatprep.mubr.msk.bf16.mxu1 %vm548_vm0, %v1368_v5 }
  0x63   :  { %1260 = vmatmul.mubr.msk.bf16.vlgmr.msra.gmra.mrb[32].mxu0 %vm548_vm0, %v1369_v6 }
  0x64   :  { %1268 = vmatmul.mubr.msk.bf16.vlgmr.msra.gmra.mrb[32].mxu1 %vm548_vm0, %v1370_v7  ;;  %1263 = vmatprep.mubr.msk.bf16.mxu0 %vm548_vm0, %v1371_v8 }
  0x65   :  { %1271 = vmatprep.mubr.msk.bf16.mxu1 %vm548_vm0, %v1372_v9 }
  0x6b   :  { %1264 = vmatmul.mubr.msk.bf16.gmra.mrb[36].mxu0 %vm548_vm0, %v1373_v10 }
  0x6c   :  { %1272 = vmatmul.mubr.msk.bf16.gmra.mrb[36].mxu1 %vm548_vm0, %v1374_v11 }
  0xf6   :  { %v1127_v12 = vpop.f32.mrb[0].mxu0 }
  0xf7   :  { %v1191_v13 = vpop.f32.mrb[0].mxu1  ;;  %v1128_v14 = vpop.f32.mrb[1].mxu0 }
  0xf8   :  { %v1129_v15 = vadd.f32 %v1128_v14, %v1127_v12  ;;  %v1192_v16 = vpop.f32.mrb[1].mxu1  ;;  %v1130_v17 = vpop.f32.mrb[2].mxu0 }
  0xf9   :  { %v1193_v18 = vadd.f32 %v1192_v16, %v1191_v13  ;;  %v1194_v19 = vpop.f32.mrb[2].mxu1  ;;  %v1131_v20 = vpop.f32.mrb[3].mxu0 }
  0xfa   :  { %v1132_v21 = vadd.f32 %v1131_v20, %v1130_v17  ;;  %v1195_v22 = vpop.f32.mrb[3].mxu1 }
  0xfb   :  { %v1196_v23 = vadd.f32 %v1195_v22, %v1194_v19  ;;  %v1626_v24 = vadd.f32 %v1193_v18, %v1129_v15 }
  0xfd   :  { %v1628_v25 = vadd.f32 %v1196_v23, %v1132_v21 }
  0xfe   :  { %v1133_v26 = vpop.f32.mrb[4].mxu0 }
  0xff   :  { %v1197_v27 = vpop.f32.mrb[4].mxu1  ;;  %v1134_v28 = vpop.f32.mrb[5].mxu0 }
 0x100   :  { %v1135_v29 = vadd.f32 %v1134_v28, %v1133_v26  ;;  %v1198_v30 = vpop.f32.mrb[5].mxu1  ;;  %v1136_v31 = vpop.f32.mrb[6].mxu0 }
 0x101   :  { %v1199_v32 = vadd.f32 %v1198_v30, %v1197_v27  ;;  %v1200_v33 = vpop.f32.mrb[6].mxu1  ;;  %v1137_v34 = vpop.f32.mrb[7].mxu0 }
 0x102   :  { %v1138_v35 = vadd.f32 %v1137_v34, %v1136_v31  ;;  %v1201_v36 = vpop.f32.mrb[7].mxu1 }
 0x103   :  { %v1202_v37 = vadd.f32 %v1201_v36, %v1200_v33  ;;  %v1630_v38 = vadd.f32 %v1199_v32, %v1135_v29 }
 0x105   :  { %v1632_v39 = vadd.f32 %v1202_v37, %v1138_v35 }
 0x106   :  { %v1139_v40 = vpop.f32.mrb[8].mxu0 }
 0x107   :  { %v1203_v41 = vpop.f32.mrb[8].mxu1  ;;  %v1140_v42 = vpop.f32.mrb[9].mxu0 }
 0x108   :  { %v1141_v43 = vadd.f32 %v1140_v42, %v1139_v40  ;;  %v1204_v44 = vpop.f32.mrb[9].mxu1  ;;  %v1142_v45 = vpop.f32.mrb[10].mxu0 }
 0x109   :  { %v1205_v46 = vadd.f32 %v1204_v44, %v1203_v41  ;;  %v1206_v47 = vpop.f32.mrb[10].mxu1  ;;  %v1143_v48 = vpop.f32.mrb[11].mxu0 }
 0x10a   :  { %v1144_v49 = vadd.f32 %v1143_v48, %v1142_v45  ;;  %v1207_v50 = vpop.f32.mrb[11].mxu1 }
 0x10b   :  { %v1208_v51 = vadd.f32 %v1207_v50, %v1206_v47  ;;  %v1634_v52 = vadd.f32 %v1205_v46, %v1141_v43 }
 0x10d   :  { %v1636_v53 = vadd.f32 %v1208_v51, %v1144_v49 }
 0x10e   :  { %v1145_v54 = vpop.f32.mrb[12].mxu0 }
 0x10f   :  { %v1209_v55 = vpop.f32.mrb[12].mxu1  ;;  %v1146_v56 = vpop.f32.mrb[13].mxu0 }
 0x110   :  { %v1147_v57 = vadd.f32 %v1146_v56, %v1145_v54  ;;  %v1210_v58 = vpop.f32.mrb[13].mxu1  ;;  %v1148_v59 = vpop.f32.mrb[14].mxu0 }
 0x111   :  { %v1211_v60 = vadd.f32 %v1210_v58, %v1209_v55  ;;  %v1212_v61 = vpop.f32.mrb[14].mxu1  ;;  %v1149_v62 = vpop.f32.mrb[15].mxu0 }
 0x112   :  { %v1150_v63 = vadd.f32 %v1149_v62, %v1148_v59  ;;  %v1213_v0 = vpop.f32.mrb[15].mxu1 }
 0x113   :  { %v1214_v1 = vadd.f32 %v1213_v0, %v1212_v61  ;;  %v1638_v2 = vadd.f32 %v1211_v60, %v1147_v57 }
 0x115   :  { %v1640_v3 = vadd.f32 %v1214_v1, %v1150_v63 }
 0x116   :  { %v1151_v4 = vpop.f32.mrb[16].mxu0 }
 0x117   :  { %v1215_v5 = vpop.f32.mrb[16].mxu1  ;;  %v1152_v6 = vpop.f32.mrb[17].mxu0 }
 0x118   :  { %v1153_v7 = vadd.f32 %v1152_v6, %v1151_v4  ;;  %v1216_v8 = vpop.f32.mrb[17].mxu1  ;;  %v1154_v9 = vpop.f32.mrb[18].mxu0 }
 0x119   :  { %v1217_v10 = vadd.f32 %v1216_v8, %v1215_v5  ;;  %v1218_v11 = vpop.f32.mrb[18].mxu1  ;;  %v1155_v12 = vpop.f32.mrb[19].mxu0 }
 0x11a   :  { %v1156_v13 = vadd.f32 %v1155_v12, %v1154_v9  ;;  %v1219_v14 = vpop.f32.mrb[19].mxu1 }
 0x11b   :  { %v1220_v15 = vadd.f32 %v1219_v14, %v1218_v11  ;;  %v737_v16 = vadd.f32 %v1217_v10, %v1153_v7 }
 0x11d   :  { %v740_v17 = vadd.f32 %v1220_v15, %v1156_v13 }
 0x11e   :  { %v1157_v18 = vpop.f32.mrb[20].mxu0 }
 0x11f   :  { %v1221_v19 = vpop.f32.mrb[20].mxu1  ;;  %v1158_v20 = vpop.f32.mrb[21].mxu0 }
 0x120   :  { %v1159_v21 = vadd.f32 %v1158_v20, %v1157_v18  ;;  %v1222_v22 = vpop.f32.mrb[21].mxu1  ;;  %v1160_v23 = vpop.f32.mrb[22].mxu0 }
 0x121   :  { %v1223_v26 = vadd.f32 %v1222_v22, %v1221_v19  ;;  %v1224_v27 = vpop.f32.mrb[22].mxu1  ;;  %v1161_v28 = vpop.f32.mrb[23].mxu0 }
 0x122   :  { %v1162_v29 = vadd.f32 %v1161_v28, %v1160_v23  ;;  %v1225_v30 = vpop.f32.mrb[23].mxu1 }
 0x123   :  { %v1226_v31 = vadd.f32 %v1225_v30, %v1224_v27  ;;  %v745_v32 = vadd.f32 %v1223_v26, %v1159_v21 }
 0x125   :  { %v748_v33 = vadd.f32 %v1226_v31, %v1162_v29 }
 0x126   :  { %v1163_v34 = vpop.f32.mrb[24].mxu0 }
 0x127   :  { %v1227_v35 = vpop.f32.mrb[24].mxu1  ;;  %v1164_v36 = vpop.f32.mrb[25].mxu0 }
 0x128   :  { %v1165_v37 = vadd.f32 %v1164_v36, %v1163_v34  ;;  %v1228_v40 = vpop.f32.mrb[25].mxu1  ;;  %v1166_v41 = vpop.f32.mrb[26].mxu0 }
 0x129   :  { %v1229_v42 = vadd.f32 %v1228_v40, %v1227_v35  ;;  %v1230_v43 = vpop.f32.mrb[26].mxu1  ;;  %v1167_v44 = vpop.f32.mrb[27].mxu0 }
 0x12a   :  { %v1168_v45 = vadd.f32 %v1167_v44, %v1166_v41  ;;  %v1231_v46 = vpop.f32.mrb[27].mxu1 }
 0x12b   :  { %v1232_v47 = vadd.f32 %v1231_v46, %v1230_v43  ;;  %v753_v48 = vadd.f32 %v1229_v42, %v1165_v37 }
 0x12d   :  { %v756_v49 = vadd.f32 %v1232_v47, %v1168_v45 }
 0x12e   :  { %v1169_v50 = vpop.f32.mrb[28].mxu0 }
 0x12f   :  { %v1233_v51 = vpop.f32.mrb[28].mxu1  ;;  %v1170_v54 = vpop.f32.mrb[29].mxu0 }
 0x130   :  { %v1171_v55 = vadd.f32 %v1170_v54, %v1169_v50  ;;  %v1234_v56 = vpop.f32.mrb[29].mxu1  ;;  %v1172_v57 = vpop.f32.mrb[30].mxu0 }
 0x131   :  { %v1235_v58 = vadd.f32 %v1234_v56, %v1233_v51  ;;  %v1236_v59 = vpop.f32.mrb[30].mxu1  ;;  %v1173_v60 = vpop.f32.mrb[31].mxu0 }
 0x132   :  { %v1174_v61 = vadd.f32 %v1173_v60, %v1172_v57  ;;  %v1237_v62 = vpop.f32.mrb[31].mxu1 }
 0x133   :  { %v1238_v63 = vadd.f32 %v1237_v62, %v1236_v59  ;;  %v761_v0 = vadd.f32 %v1235_v58, %v1171_v55 }
 0x135   :  { %v764_v1 = vadd.f32 %v1238_v63, %v1174_v61 }
 0x136   :  { %v1261_v4 = vpop.f32.mrb[32].mxu0 }
 0x137   :  { %v810_v5 = vadd.f32 %v1261_v4, %v1630_v38  ;;  %v1269_v6 = vpop.f32.mrb[32].mxu1  ;;  %v801_v7 = vpop.f32.mrb[33].mxu0 }
 0x138   :  { %v842_v8 = vadd.f32 %v1269_v6, %v745_v32  ;;  %v802_v9 = vadd.f32 %v801_v7, %v1626_v24  ;;  %v833_v10 = vpop.f32.mrb[33].mxu1  ;;  %v1262_v11 = vpop.f32.mrb[34].mxu0 }
 0x139   :  { %v834_v12 = vadd.f32 %v833_v10, %v737_v16  ;;  %v813_v13 = vadd.f32 %v1262_v11, %v1632_v39  ;;  %v1270_v14 = vpop.f32.mrb[34].mxu1  ;;  %v804_v15 = vpop.f32.mrb[35].mxu0 }
 0x13a   :  { %v845_v18 = vadd.f32 %v1270_v14, %v748_v33  ;;  %v805_v19 = vadd.f32 %v804_v15, %v1628_v25  ;;  %v836_v20 = vpop.f32.mrb[35].mxu1 }
 0x13b   :  { %v1072_v21 = vpack.c.bf16 %v813_v13, %v810_v5  ;;  %v837_v22 = vadd.f32 %v836_v20, %v740_v17 }
 0x13c   :  { %v1092_v23 = vpack.c.bf16 %v845_v18, %v842_v8  ;;  %v1067_v38 = vpack.c.bf16 %v805_v19, %v802_v9 }
 0x13d   :  { %1104 = vst [vmem:[%s1676_s2 + $0x8] sm:$0xff] %v1072_v21   ;;  %v1087_v24 = vpack.c.bf16 %v837_v22, %v834_v12 }
 0x13e   :  { %1108 = vst [vmem:[%s1676_s2 + $0x28] sm:$0xff] %v1092_v23   ;;  %1068 = vst [vmem:[%s1676_s2] sm:$0xff] %v1067_v38   ;;  %v1265_v39 = vpop.f32.mrb[36].mxu0 }
 0x13f   :  { %1107 = vst [vmem:[%s1676_s2 + $0x20] sm:$0xff] %v1087_v24   ;;  %v826_v25 = vadd.f32 %v1265_v39, %v1638_v2  ;;  %v1273_v16 = vpop.f32.mrb[36].mxu1  ;;  %v817_v17 = vpop.f32.mrb[37].mxu0 }
 0x140   :  { %v858_v26 = vadd.f32 %v1273_v16, %v761_v0  ;;  %v818_v27 = vadd.f32 %v817_v17, %v1634_v52  ;;  %v849_v28 = vpop.f32.mrb[37].mxu1  ;;  %v1266_v29 = vpop.f32.mrb[38].mxu0 }
 0x141   :  { %v850_v30 = vadd.f32 %v849_v28, %v753_v48  ;;  %v829_v31 = vadd.f32 %v1266_v29, %v1640_v3  ;;  %v1274_v32 = vpop.f32.mrb[38].mxu1  ;;  %v820_v33 = vpop.f32.mrb[39].mxu0 }
 0x142   :  { %v861_v34 = vadd.f32 %v1274_v32, %v764_v1  ;;  %v821_v35 = vadd.f32 %v820_v33, %v1636_v53  ;;  %v852_v36 = vpop.f32.mrb[39].mxu1 }
 0x143   :  { %v1082_v37 = vpack.c.bf16 %v829_v31, %v826_v25  ;;  %v853_v40 = vadd.f32 %v852_v36, %v756_v49 }
 0x144   :  { %v1102_v41 = vpack.c.bf16 %v861_v34, %v858_v26  ;;  %v1077_v2 = vpack.c.bf16 %v821_v35, %v818_v27 }
 0x145   :  { %1106 = vst [vmem:[%s1676_s2 + $0x18] sm:$0xff] %v1082_v37   ;;  %v1097_v52 = vpack.c.bf16 %v853_v40, %v850_v30 }
 0x146   :  { %1110 = vst [vmem:[%s1676_s2 + $0x38] sm:$0xff] %v1102_v41   ;;  %1105 = vst [vmem:[%s1676_s2 + $0x10] sm:$0xff] %v1077_v2  }
 0x147   :  { %1109 = vst [vmem:[%s1676_s2 + $0x30] sm:$0xff] %v1097_v52  }

</bundles_post_ra>
